<compile_context>
chip_gen: v7x
topology: tpu7x:2x2x1
jax: 0.10.0
libtpu: 0.0.40
codegen_flags: <defaults>
</compile_context>

<pallas_src>
import functools

import jax
import jax.numpy as jnp
from jax import lax
from jax.experimental import pallas as pl
from jax.experimental.pallas import tpu as pltpu


def encoder_kernel(x_ref, w1_ref, b1_ref, w2_ref, b2_ref, wh_ref, bh_ref,
                   out_ref):
    x = x_ref[...]

    # fc1 + relu  (MXU matmul, f32 accumulate)
    h1 = jnp.dot(x, w1_ref[...], preferred_element_type=jnp.float32) + b1_ref[...]
    h1 = jnp.maximum(h1, 0.0)

    # fc2 + relu
    h2 = jnp.dot(h1, w2_ref[...], preferred_element_type=jnp.float32) + b2_ref[...]
    h2 = jnp.maximum(h2, 0.0)

    # Fused mean/std heads, emitted transposed: contract w_head's h2_dim axis
    # against h2's feature axis -> (2*latent, tile_b).  Last (lane) dim is
    # tile_b, so the store is lane-dense instead of a 4-wide masked store.
    head_t = lax.dot_general(
        wh_ref[...], h2,
        dimension_numbers=(((0,), (1,)), ((), ())),
        preferred_element_type=jnp.float32)
    out_ref[...] = (head_t + bh_ref[...]).astype(out_ref.dtype)


def _pick_tile_b(B, max_tile_b=4096):
    """Batch tile size.

    The output block's lane (last) dim is tile_b, so when the batch is tiled
    (grid > 1) tile_b must be a multiple of 128; a single full-batch block is
    always legal.  Keep the grid >= 2 steps whenever we can so the "parallel"
    axis shards across both TensorCores on v7x (no-op on v5e/v6e).
    """
    if B <= 256:
        return B                                   # single block, grid=(1,)
    target = min(max_tile_b, -(-B // 2))           # ceil(B/2) -> >= 2 steps
    return max(128, (target // 128) * 128)         # round down to 128-multiple


def _vmem_limit_bytes(tile_b, D, h1_dim, h2_dim, two_latent, x_itemsize):
    """Padding-aware VMEM budget (lane pad to 128, sublane pad to 8)."""
    lane = lambda n: ((n + 127) // 128) * 128
    sub = lambda n: ((n + 7) // 8) * 8
    x_buf = 2 * sub(tile_b) * lane(D) * x_itemsize              # double-buffered x
    out_buf = 2 * sub(two_latent) * lane(tile_b) * 4            # double-buffered out
    interm = sub(tile_b) * (lane(h1_dim) + lane(h2_dim) + lane(two_latent)) * 4
    weights = 2 * 4 * (sub(D) * lane(h1_dim) + sub(h1_dim) * lane(h2_dim)
                       + sub(h2_dim) * lane(two_latent) + 3 * 8 * 128)
    est = x_buf + out_buf + interm + weights + (1 << 20)        # +1 MiB slack
    return int(min(64 << 20, max(32 << 20, 2 * est)))


def pack_encoder_params(p):
    """Pre-fuse the mean/std heads (hoisted out of the per-call path).

    Returns (w1, b1, w2, b2, w_head[h2,2L], b_head[2L,1])."""
    w_head = jnp.concatenate([p["wm"], p["ws"]], axis=1)         # [h2, 2*latent]
    b_head = jnp.concatenate([p["bm"], p["bs"]], axis=1).T       # [2*latent, 1]
    return (p["w1"], p["b1"], p["w2"], p["b2"], w_head, b_head)


@functools.partial(jax.jit, static_argnames=("max_tile_b", "stream_bf16"))
def encoder_forward(x, packed, *, max_tile_b=4096, stream_bf16=False):
    """Run the VAE encoder forward pass in one Pallas kernel.

    Args:
      x: [B, data_size] float32
      packed: output of pack_encoder_params
      stream_bf16: stream x / W1 as bf16 (f32 accumulate); slight numeric delta.
    Returns:
      (mean [B, latent], log_std [B, latent])
    """
    w1, b1, w2, b2, w_head, b_head = packed
    B, D = x.shape
    h1_dim = w1.shape[1]
    h2_dim = w2.shape[1]
    two_latent = w_head.shape[1]
    latent = two_latent // 2

    if stream_bf16:
        # x dominates HBM bytes on this read-bound kernel; halve them.
        x = x.astype(jnp.bfloat16)
        w1 = w1.astype(jnp.bfloat16)

    tile_b = _pick_tile_b(B, max_tile_b)
    grid = (pl.cdiv(B, tile_b),)

    # x: tiled over batch only (feature dim 64 stays full-extent).
    x_spec = pl.BlockSpec((tile_b, D), lambda i: (i, 0))
    # Output: transposed head, batch on the lane axis -> lane-dense stores.
    out_spec = pl.BlockSpec((two_latent, tile_b), lambda i: (0, i))

    # Weights/biases: full arrays, constant index_map -> VMEM-resident.
    def const_spec(arr):
        return pl.BlockSpec(arr.shape, lambda i: (0, 0))

    weight_args = (w1, b1, w2, b2, w_head, b_head)

    flops = 2 * B * (D * h1_dim + h1_dim * h2_dim + h2_dim * two_latent)
    weight_bytes = sum(int(a.size) * a.dtype.itemsize for a in weight_args)
    bytes_accessed = B * D * x.dtype.itemsize + B * two_latent * 4 + weight_bytes

    head_t = pl.pallas_call(
        encoder_kernel,
        out_shape=jax.ShapeDtypeStruct((two_latent, B), jnp.float32),
        grid=grid,
        in_specs=[x_spec] + [const_spec(a) for a in weight_args],
        out_specs=out_spec,
        compiler_params=pltpu.CompilerParams(
            dimension_semantics=("parallel",),
            vmem_limit_bytes=_vmem_limit_bytes(
                tile_b, D, h1_dim, h2_dim, two_latent, x.dtype.itemsize)),
        cost_estimate=pl.CostEstimate(
            flops=flops, transcendentals=0, bytes_accessed=bytes_accessed),
    )(x, *weight_args)

    mean = head_t[:latent, :].T
    log_std = head_t[latent:, :].T
    return mean, log_std


def init_encoder_params(key, data_size=64, latent_size=2):
    """Deterministic init mimicking nn.Linear default (uniform +/- 1/sqrt(fan_in)).

    Weights are stored [in, out]; biases as [1, out] (2-D for TPU layout)."""
    h1 = data_size // 4
    h2 = data_size // 16

    def linear(k, fan_in, fan_out):
        kw, kb = jax.random.split(k)
        bound = 1.0 / jnp.sqrt(fan_in)
        w = jax.random.uniform(kw, (fan_in, fan_out), jnp.float32, -bound, bound)
        b = jax.random.uniform(kb, (1, fan_out), jnp.float32, -bound, bound)
        return w, b

    k1, k2, k3, k4 = jax.random.split(key, 4)
    w1, b1 = linear(k1, data_size, h1)
    w2, b2 = linear(k2, h1, h2)
    wm, bm = linear(k3, h2, latent_size)
    ws, bs = linear(k4, h2, latent_size)
    return dict(w1=w1, b1=b1, w2=w2, b2=b2, wm=wm, bm=bm, ws=ws, bs=bs)


def encoder_ref(x, p):
    """Pure-JAX reference (matches PyTorch forward: std head is a raw linear
    output interpreted as log-std)."""
    h1 = jnp.maximum(x @ p["w1"] + p["b1"], 0.0)
    h2 = jnp.maximum(h1 @ p["w2"] + p["b2"], 0.0)
    return h2 @ p["wm"] + p["bm"], h2 @ p["ws"] + p["bs"]


if __name__ == "__main__":
    # Small shapes consistent with the module: data_size=64 -> 16 -> 4 -> latent=2
    B, DATA, LATENT = 8, 64, 2

    key = jax.random.PRNGKey(0)
    kx, kp = jax.random.split(key)
    x = jax.random.normal(kx, (B, DATA), dtype=jnp.float32)
    params = init_encoder_params(kp, data_size=DATA, latent_size=LATENT)
    packed = pack_encoder_params(params)

    mean, log_std = encoder_forward(x, packed)
    jax.block_until_ready((mean, log_std))

    mean_ref, std_ref = encoder_ref(x, params)
    assert mean.shape == (B, LATENT) and log_std.shape == (B, LATENT)
    assert jnp.allclose(mean, mean_ref, atol=1e-5, rtol=1e-5)
    assert jnp.allclose(log_std, std_ref, atol=1e-5, rtol=1e-5)

    # Tiled / pipelined path: grid >= 2 steps, ragged last block.
    B2 = 2500
    x2 = jax.random.normal(jax.random.PRNGKey(1), (B2, DATA), dtype=jnp.float32)
    m2, s2 = encoder_forward(x2, packed)
    jax.block_until_ready((m2, s2))
    m2r, s2r = encoder_ref(x2, params)
    assert jnp.allclose(m2, m2r, atol=1e-5, rtol=1e-5)
    assert jnp.allclose(s2, s2r, atol=1e-5, rtol=1e-5)

    # Opt-in bf16 x-streaming path (halves HBM read bytes; looser tolerance).
    m3, s3 = encoder_forward(x2, packed, stream_bf16=True)
    jax.block_until_ready((m3, s3))
    assert jnp.allclose(m3, m2r, atol=5e-2, rtol=5e-2)
    assert jnp.allclose(s3, s2r, atol=5e-2, rtol=5e-2)

    print("KERNEL_OK")
</pallas_src>

<mosaic_0001>
module attributes {stable_mosaic.version = 11 : i64} {
  func.func @encoder_kernel(%arg0: i32, %arg1: memref<8x64xf32, #tpu.memory_space<vmem>>, %arg2: memref<64x16xf32, #tpu.memory_space<vmem>>, %arg3: memref<1x16xf32, #tpu.memory_space<vmem>>, %arg4: memref<16x4xf32, #tpu.memory_space<vmem>>, %arg5: memref<1x4xf32, #tpu.memory_space<vmem>>, %arg6: memref<4x4xf32, #tpu.memory_space<vmem>>, %arg7: memref<4x1xf32, #tpu.memory_space<vmem>>, %arg8: memref<4x8xf32, #tpu.memory_space<vmem>>) attributes {dimension_semantics = [#tpu.dimension_semantics<parallel>], iteration_bounds = array<i64: 1>, scalar_prefetch = 0 : i64, scratch_operands = 0 : i64, tpu.core_type = #tpu.core_type<tc>, window_params = [{transform_indices = @transform_0, window_bounds = array<i64: 8, 64>}, {pipeline_mode = #tpu.pipeline_mode<synchronous>, transform_indices = @transform_1, window_bounds = array<i64: 64, 16>}, {pipeline_mode = #tpu.pipeline_mode<synchronous>, transform_indices = @transform_2, window_bounds = array<i64: 1, 16>}, {pipeline_mode = #tpu.pipeline_mode<synchronous>, transform_indices = @transform_3, window_bounds = array<i64: 16, 4>}, {pipeline_mode = #tpu.pipeline_mode<synchronous>, transform_indices = @transform_4, window_bounds = array<i64: 1, 4>}, {pipeline_mode = #tpu.pipeline_mode<synchronous>, transform_indices = @transform_5, window_bounds = array<i64: 4, 4>}, {pipeline_mode = #tpu.pipeline_mode<synchronous>, transform_indices = @transform_6, window_bounds = array<i64: 4, 1>}, {transform_indices = @transform_7, window_bounds = array<i64: 4, 8>}]} {
    %c0 = arith.constant 0 : index
    %c0_0 = arith.constant 0 : index
    %0 = vector.load %arg1[%c0, %c0_0] : memref<8x64xf32, #tpu.memory_space<vmem>>, vector<8x64xf32>
    %c0_1 = arith.constant 0 : index
    %c0_2 = arith.constant 0 : index
    %1 = vector.load %arg2[%c0_1, %c0_2] : memref<64x16xf32, #tpu.memory_space<vmem>>, vector<64x16xf32>
    %cst = arith.constant dense<0.000000e+00> : vector<8x16xf32>
    %2 = tpu.matmul %0, %1, %cst {dimension_numbers = #tpu.dot_dimension_numbers<[1], [0], [0], [1], [0, 0, 1, 1], [], []>} : vector<8x64xf32>, vector<64x16xf32>, vector<8x16xf32> -> vector<8x16xf32>
    %c0_3 = arith.constant 0 : index
    %c0_4 = arith.constant 0 : index
    %3 = vector.load %arg3[%c0_3, %c0_4] : memref<1x16xf32, #tpu.memory_space<vmem>>, vector<1x16xf32>
    %4 = vector.broadcast %3 : vector<1x16xf32> to vector<8x16xf32>
    %5 = arith.addf %2, %4 : vector<8x16xf32>
    %cst_5 = arith.constant 0.000000e+00 : f32
    %6 = vector.broadcast %cst_5 : f32 to vector<8x16xf32>
    %7 = arith.maximumf %5, %6 : vector<8x16xf32>
    %c0_6 = arith.constant 0 : index
    %c0_7 = arith.constant 0 : index
    %8 = vector.load %arg4[%c0_6, %c0_7] : memref<16x4xf32, #tpu.memory_space<vmem>>, vector<16x4xf32>
    %cst_8 = arith.constant dense<0.000000e+00> : vector<8x4xf32>
    %9 = tpu.matmul %7, %8, %cst_8 {dimension_numbers = #tpu.dot_dimension_numbers<[1], [0], [0], [1], [0, 0, 1, 1], [], []>} : vector<8x16xf32>, vector<16x4xf32>, vector<8x4xf32> -> vector<8x4xf32>
    %c0_9 = arith.constant 0 : index
    %c0_10 = arith.constant 0 : index
    %10 = vector.load %arg5[%c0_9, %c0_10] : memref<1x4xf32, #tpu.memory_space<vmem>>, vector<1x4xf32>
    %11 = vector.broadcast %10 : vector<1x4xf32> to vector<8x4xf32>
    %12 = arith.addf %9, %11 : vector<8x4xf32>
    %cst_11 = arith.constant 0.000000e+00 : f32
    %13 = vector.broadcast %cst_11 : f32 to vector<8x4xf32>
    %14 = arith.maximumf %12, %13 : vector<8x4xf32>
    %c0_12 = arith.constant 0 : index
    %c0_13 = arith.constant 0 : index
    %15 = vector.load %arg6[%c0_12, %c0_13] : memref<4x4xf32, #tpu.memory_space<vmem>>, vector<4x4xf32>
    %cst_14 = arith.constant dense<0.000000e+00> : vector<4x8xf32>
    %16 = tpu.matmul %15, %14, %cst_14 {dimension_numbers = #tpu.dot_dimension_numbers<[0], [1], [1], [0], [0, 1, 1, 0], [], []>} : vector<4x4xf32>, vector<8x4xf32>, vector<4x8xf32> -> vector<4x8xf32>
    %c0_15 = arith.constant 0 : index
    %c0_16 = arith.constant 0 : index
    %17 = vector.load %arg7[%c0_15, %c0_16] : memref<4x1xf32, #tpu.memory_space<vmem>>, vector<4x1xf32>
    %18 = vector.broadcast %17 : vector<4x1xf32> to vector<4x8xf32>
    %19 = arith.addf %16, %18 : vector<4x8xf32>
    %c0_17 = arith.constant 0 : index
    %c0_18 = arith.constant 0 : index
    %20 = vector.load %arg8[%c0_17, %c0_18] : memref<4x8xf32, #tpu.memory_space<vmem>>, vector<4x8xf32>
    tpu.vector_store %arg8[%c0_17, %c0_18], %19 {strides = array<i32>} : memref<4x8xf32, #tpu.memory_space<vmem>>, vector<4x8xf32>,
    return
  }
  func.func @transform_0(%arg0: i32) -> (i32, i32) {
    %c0_i32 = arith.constant 0 : i32
    %c0_i32_0 = arith.constant 0 : i32
    return %arg0, %c0_i32 : i32, i32
  }
  func.func @transform_1(%arg0: i32) -> (i32, i32) {
    %c0_i32 = arith.constant 0 : i32
    %c0_i32_0 = arith.constant 0 : i32
    %c0_i32_1 = arith.constant 0 : i32
    return %c0_i32, %c0_i32_0 : i32, i32
  }
  func.func @transform_2(%arg0: i32) -> (i32, i32) {
    %c0_i32 = arith.constant 0 : i32
    %c0_i32_0 = arith.constant 0 : i32
    %c0_i32_1 = arith.constant 0 : i32
    return %c0_i32, %c0_i32_0 : i32, i32
  }
  func.func @transform_3(%arg0: i32) -> (i32, i32) {
    %c0_i32 = arith.constant 0 : i32
    %c0_i32_0 = arith.constant 0 : i32
    %c0_i32_1 = arith.constant 0 : i32
    return %c0_i32, %c0_i32_0 : i32, i32
  }
  func.func @transform_4(%arg0: i32) -> (i32, i32) {
    %c0_i32 = arith.constant 0 : i32
    %c0_i32_0 = arith.constant 0 : i32
    %c0_i32_1 = arith.constant 0 : i32
    return %c0_i32, %c0_i32_0 : i32, i32
  }
  func.func @transform_5(%arg0: i32) -> (i32, i32) {
    %c0_i32 = arith.constant 0 : i32
    %c0_i32_0 = arith.constant 0 : i32
    %c0_i32_1 = arith.constant 0 : i32
    return %c0_i32, %c0_i32_0 : i32, i32
  }
  func.func @transform_6(%arg0: i32) -> (i32, i32) {
    %c0_i32 = arith.constant 0 : i32
    %c0_i32_0 = arith.constant 0 : i32
    %c0_i32_1 = arith.constant 0 : i32
    return %c0_i32, %c0_i32_0 : i32, i32
  }
  func.func @transform_7(%arg0: i32) -> (i32, i32) {
    %c0_i32 = arith.constant 0 : i32
    %c0_i32_0 = arith.constant 0 : i32
    return %c0_i32, %arg0 : i32, i32
  }
}

</mosaic_0001>

<bundles_post_ra>
// kernel: encoder_forward.1
= control target key start
LH: loop header
LB: loop body
LE: loop exit
PB: predicated region body
PF: predicated region fallthrough
CT: control target
= control target key end

     0   :  { %v394_v0 = vmov 0.0|0.0   ;;  %vm395_vm0 = vmmov 0   ;;  %v396_v4 = vmov 0.0   ;;  %vm42_vm1 = vcmask 523264   ;;  %s489_s1 = inlined_call_operand.vmem [shape: f32[64,16], index: 1, kind: input, shape index: {}]   ;;  %s490_s0 = inlined_call_operand.vmem [shape: f32[8,64], index: 0, kind: input, shape index: {}]   ;;  %s491_s3 = inlined_call_operand.vmem [shape: f32[16,4], index: 3, kind: input, shape index: {}]   ;;  %s492_s5 = inlined_call_operand.vmem [shape: f32[4,4], index: 5, kind: input, shape index: {}]   ;;  %s493_s2 = inlined_call_operand.vmem [shape: f32[1,16], index: 2, kind: input, shape index: {}]   ;;  %s494_s6 = inlined_call_operand.vmem [shape: f32[4,1], index: 6, kind: input, shape index: {}]   ;;  %s495_s4 = inlined_call_operand.vmem [shape: f32[1,4], index: 4, kind: input, shape index: {}]   ;;  %s496_s7 = inlined_call_operand.vmem [shape: f32[4,8], index: 7, kind: output, shape index: {}]  }
   0x1   :  { %374 = vmatprep.subr.bf16.mxu0 %v394_v0  ;;  %v27_v1 = vld [vmem:[%s489_s1] sm:$0xff]  ;;  %v28_v2 = vld [vmem:[%s489_s1 + $0x8] sm:$0xff]  ;;  %v29_v3 = vld [vmem:[%s489_s1 + $0x10] sm:$0xff]  ;;  %359 = vmatprep.mubr.msk.f32.mxu0 %vm395_vm0, %v396_v4  ;;  %vm126_vm2 = vcmask 130048   ;;  %v397_v24 = vmov 0   ;;  %vm240_vm3 = vcmask 31744  }
   0x2   :  { %v375_v5 = vpack.c.bf16 %v28_v2, %v27_v1  ;;  %v30_v6 = vld [vmem:[%s489_s1 + $0x18] sm:$0xff]  ;;  %386 = vmatprep.subr.bf16.mxu1 %v394_v0  ;;  %366 = vmatprep.mubr.msk.f32.mxu1 %vm395_vm0, %v396_v4  ;;  %v31_v8 = vld [vmem:[%s489_s1 + $0x20] sm:$0xff]  ;;  %v32_v9 = vld [vmem:[%s489_s1 + $0x28] sm:$0xff]  ;;  %vm317_vm4 = vcmask 60416  }
   0x3   :  { %v378_v7 = vpack.c.bf16 %v30_v6, %v29_v3  ;;  %v381_v10 = vpack.c.bf16 %v32_v9, %v31_v8  ;;  %v33_v11 = vld [vmem:[%s489_s1 + $0x30] sm:$0xff]  ;;  %v34_v12 = vld [vmem:[%s489_s1 + $0x38] sm:$0xff]  ;;  %v26_v14 = vld [vmem:[%s490_s0] sm:$0xff] }
   0x4   :  { %376 = vmatpush3.bf16.msra.mxu0 %v375_v5  ;;  %v384_v13 = vpack.c.bf16 %v34_v12, %v33_v11  ;;  %v117_v15 = vld [vmem:[%s491_s3] sm:$0xff]  ;;  %v118_v16 = vld [vmem:[%s491_s3 + $0x8] sm:$0xff] }
   0x5   :  { %377 = vmatprep.subr.bf16.mxu0 %v394_v0  ;;  %v387_v17 = vpack.c.bf16 %v118_v16, %v117_v15  ;;  %v201_v18 = vld [vmem:[%s492_s5] sm:$0xf] }
   0x6   :  { %208 = vxpose.xlu0.b32.start.end [1/1] (short) (narrow) %v201_v18, 8  ;;  %v323_v19 = vld [vmem:[%s493_s2] ss:$0 sm:$0xff] }
   0x7   :  { %388 = vmatpush3.bf16.msra.mxu1 %v387_v17  ;;  %v202_v25 = vld [vmem:[%s494_s6] sm:$0xf] }
   0x8   :  { %379 = vmatpush3.bf16.msra.mxu0 %v378_v7  ;;  %369 = vmatprep.subr.mxu1 %v396_v4  ;;  %v325_v26 = vld [vmem:[%s495_s4] ss:$0 sm:$0xff] }
   0x9   :  { %380 = vmatprep.subr.bf16.mxu0 %v394_v0 }
   0xc   :  { %382 = vmatpush3.bf16.msra.mxu0 %v381_v10 }
   0xd   :  { %383 = vmatprep.subr.bf16.mxu0 %v394_v0 }
  0x10   :  { %385 = vmatpush3.bf16.msra.mxu0 %v384_v13 }
  0x13   :  { %360 = vmatmul.mubr.msk.f32.vlgmr.msra.gmra.mrb[0].mxu0 %vm42_vm1, %v26_v14 }
  0x2f   :  { %393 = vset.pattern.permute.xlu0 %v397_v24 }
  0x30   :  { %205 = vperm.xlu0 %393, %v202_v25  }
  0x86   :  { %v224_v31 = vpop.trf.xlu0 }
  0xaf   :  { %v206_v32 = vpop.permute.xlu0 %205 }
  0xe6   :  { %v112_v20 = vpop.f32.mrb[0].mxu0 }
  0xe7   :  { %v113_v21 = vadd.f32 %v323_v19, %v112_v20  ;;  %v361_v22 = vpop.f32.mrb[1].mxu0 }
  0xe9   :  { %v116_v23 = vmax.f32 %v113_v21, 0.0 }
  0xeb   :  { %367 = vmatmul.mubr.msk.f32.vlgmr.msra.gmra.mrb[0].mxu1 %vm126_vm2, %v116_v23 }
  0xec   :  { %371 = vmatprep.mubr.msk.f32.mxu1 %vm395_vm0, %v396_v4 }
 0x1be   :  { %v196_v27 = vpop.f32.mrb[0].mxu1 }
 0x1bf   :  { %v197_v28 = vadd.f32 %v325_v26, %v196_v27  ;;  %v368_v29 = vpop.f32.mrb[1].mxu1 }
 0x1c1   :  { %v200_v30 = vmax.f32 %v197_v28, 0.0 }
 0x1c3   :  { %370 = vmatpush3.xpose.msk.msra.mxu1 %vm240_vm3, %v200_v30 }
 0x1c6   :  { %372 = vmatmul.mubr.msk.f32.vlgmr.msra.gmra.mrb[2].mxu1 %vm240_vm3, %v224_v31 }
 0x299   :  { %v313_v33 = vpop.f32.mrb[2].mxu1 }
 0x29a   :  { %v314_v34 = vadd.f32 %v313_v33, %v206_v32  ;;  %v373_v35 = vpop.f32.mrb[3].mxu1 }
 0x29c   :  { %318 = vst.msk [vmem:[%s496_s7] sm:$0xf] %vm317_vm4, %v314_v34 }

</bundles_post_ra>
